<compile_context>
chip_gen: v7x
topology: tpu7x:2x2x1
jax: 0.10.0
libtpu: 0.0.40
codegen_flags: <defaults>
</compile_context>

<pallas_src>
import functools

import jax
import jax.numpy as jnp
from jax import lax
from jax.experimental import pallas as pl
from jax.experimental.pallas import tpu as pltpu


# ----------------------------------------------------------------------------
# Pallas kernel: one grid step == one batch row; full LSTM recurrence + fused
# output projection run inside the body.  Everything inside is 2D (sublane =
# time or batch-row-of-1, lane = feature) so all ref ops are simple
# leading-axis / sublane-dim accesses.
# ----------------------------------------------------------------------------
def _lstm_seq_kernel(x_ref, wih_ref, whh_ref, b_ref, wfc_ref, bfc_ref,
                     y_ref, gx_sc, hs_sc, *, seq_len, hidden):
    H = hidden

    # Hoisted input projection for the whole sequence of this batch row:
    # (S, A) @ (A, 4H) + (b_ih + b_hh)  ->  one MXU call instead of S tiny ones.
    gx_sc[...] = (jnp.dot(x_ref[0], wih_ref[...],
                          preferred_element_type=jnp.float32)
                  + b_ref[...])

    # Hoist the recurrent weight load out of the time loop (loop invariant).
    w_hh = whh_ref[...]                      # (H, 4H)

    def step(t, carry):
        h_prev, c_prev = carry               # each (1, H)
        gates = (gx_sc[pl.ds(t, 1), :]       # (1, 4H) precomputed x-part
                 + jnp.dot(h_prev, w_hh,
                           preferred_element_type=jnp.float32))
        i_g = jax.nn.sigmoid(gates[:, 0 * H:1 * H])
        f_g = jax.nn.sigmoid(gates[:, 1 * H:2 * H])
        g_g = jnp.tanh(gates[:, 2 * H:3 * H])
        o_g = jax.nn.sigmoid(gates[:, 3 * H:4 * H])
        c_new = f_g * c_prev + i_g * g_g
        h_new = o_g * jnp.tanh(c_new)
        hs_sc[pl.ds(t, 1), :] = h_new        # collect h_t for batched Linear
        return h_new, c_new

    h0 = jnp.zeros((1, H), jnp.float32)
    c0 = jnp.zeros((1, H), jnp.float32)
    # Short fixed trip count: unroll so the LLO scheduler sees the whole chain.
    unroll = True if seq_len <= 32 else 8
    lax.fori_loop(0, seq_len, step, (h0, c0), unroll=unroll)

    # Batched final Linear(10 -> fc_len) over all timesteps:
    # one (S, H) @ (H, F) matmul + one dense (S, F) store.
    y_ref[0] = (jnp.dot(hs_sc[...], wfc_ref[...],
                        preferred_element_type=jnp.float32)
                + bfc_ref[...]).astype(y_ref.dtype)


def lstm_forecaster_pallas(x, params):
    """x: (batch, seq, num_assets) float32.  Returns (batch, seq, fc_len)."""
    wih_t, whh_t, b, wfc_t, bfc = params
    B, S, A = x.shape
    H = whh_t.shape[0]
    F = wfc_t.shape[1]

    kernel = functools.partial(_lstm_seq_kernel, seq_len=S, hidden=H)

    flops = B * (2 * S * A * 4 * H          # hoisted input projection
                 + S * 2 * H * 4 * H        # recurrent matmuls
                 + 2 * S * H * F)           # batched output projection
    transcendentals = B * S * 5 * H         # 3 sigmoid + 2 tanh per unit/step
    bytes_accessed = 4 * (B * S * A + B * S * F
                          + A * 4 * H + H * 4 * H + 4 * H + H * F + F)

    y = pl.pallas_call(
        kernel,
        out_shape=jax.ShapeDtypeStruct((B, S, F), jnp.float32),
        grid_spec=pltpu.PrefetchScalarGridSpec(
            num_scalar_prefetch=0,
            grid=(B,),                                            # batch only
            in_specs=[
                pl.BlockSpec((1, S, A), lambda i: (i, 0, 0)),     # x row i
                pl.BlockSpec((A, 4 * H), lambda i: (0, 0)),       # W_ih^T
                pl.BlockSpec((H, 4 * H), lambda i: (0, 0)),       # W_hh^T
                pl.BlockSpec((1, 4 * H), lambda i: (0, 0)),       # b_ih + b_hh
                pl.BlockSpec((H, F), lambda i: (0, 0)),           # W_fc^T
                pl.BlockSpec((1, F), lambda i: (0, 0)),           # b_fc
            ],
            out_specs=pl.BlockSpec((1, S, F), lambda i: (i, 0, 0)),
            scratch_shapes=[
                pltpu.VMEM((S, 4 * H), jnp.float32),   # precomputed x-gates
                pltpu.VMEM((S, H), jnp.float32),       # hidden-state history
            ],
        ),
        compiler_params=pltpu.CompilerParams(
            dimension_semantics=("parallel",)),        # batch rows independent
        cost_estimate=pl.CostEstimate(
            flops=flops, transcendentals=transcendentals,
            bytes_accessed=bytes_accessed),
    )(x, wih_t, whh_t, b, wfc_t, bfc)
    return y


# ----------------------------------------------------------------------------
# Pure-JAX reference (lax.scan) for correctness checking.
# ----------------------------------------------------------------------------
def lstm_forecaster_ref(x, params):
    wih_t, whh_t, b, wfc_t, bfc = params
    B = x.shape[0]
    H = whh_t.shape[0]
    x_tm = jnp.transpose(x, (1, 0, 2))

    def step(carry, x_t):
        h, c = carry
        gates = x_t @ wih_t + h @ whh_t + b
        i_g = jax.nn.sigmoid(gates[:, :H])
        f_g = jax.nn.sigmoid(gates[:, H:2 * H])
        g_g = jnp.tanh(gates[:, 2 * H:3 * H])
        o_g = jax.nn.sigmoid(gates[:, 3 * H:])
        c = f_g * c + i_g * g_g
        h = o_g * jnp.tanh(c)
        return (h, c), h @ wfc_t + bfc

    init = (jnp.zeros((B, H), jnp.float32), jnp.zeros((B, H), jnp.float32))
    _, ys = lax.scan(step, init, x_tm)
    return jnp.transpose(ys, (1, 0, 2))


# ----------------------------------------------------------------------------
# Deterministic parameter init (matches PyTorch shapes; uniform(-1/sqrt(H), ..))
# ----------------------------------------------------------------------------
def init_params(key, num_assets, hidden, fc_len):
    k = 1.0 / jnp.sqrt(hidden)
    keys = jax.random.split(key, 6)
    # PyTorch stores weight_ih_l0: (4H, A); we pre-transpose to (A, 4H) etc.
    w_ih = jax.random.uniform(keys[0], (4 * hidden, num_assets), jnp.float32, -k, k)
    w_hh = jax.random.uniform(keys[1], (4 * hidden, hidden), jnp.float32, -k, k)
    b_ih = jax.random.uniform(keys[2], (4 * hidden,), jnp.float32, -k, k)
    b_hh = jax.random.uniform(keys[3], (4 * hidden,), jnp.float32, -k, k)
    w_fc = jax.random.uniform(keys[4], (fc_len, hidden), jnp.float32, -k, k)
    b_fc = jax.random.uniform(keys[5], (fc_len,), jnp.float32, -k, k)
    return (w_ih.T, w_hh.T, (b_ih + b_hh)[None, :], w_fc.T, b_fc[None, :])


if __name__ == "__main__":
    batch, seq, num_assets = 2, 8, 4
    hidden, fc_len = 10, 5

    key = jax.random.PRNGKey(0)
    k_x, k_p = jax.random.split(key)
    x = jax.random.normal(k_x, (batch, seq, num_assets), jnp.float32)
    params = init_params(k_p, num_assets, hidden, fc_len)

    out = lstm_forecaster_pallas(x, params)
    out = jax.block_until_ready(out)

    ref = jax.block_until_ready(lstm_forecaster_ref(x, params))
    assert out.shape == (batch, seq, fc_len), out.shape
    assert jnp.allclose(out, ref, rtol=1e-4, atol=1e-4), \
        f"max abs err = {jnp.max(jnp.abs(out - ref))}"

    print("KERNEL_OK")
</pallas_src>

<mosaic_0001>
module attributes {stable_mosaic.version = 11 : i64} {
  func.func @_lstm_seq_kernel(%arg0: i32, %arg1: memref<1x8x4xf32, #tpu.memory_space<vmem>>, %arg2: memref<4x40xf32, #tpu.memory_space<vmem>>, %arg3: memref<10x40xf32, #tpu.memory_space<vmem>>, %arg4: memref<1x40xf32, #tpu.memory_space<vmem>>, %arg5: memref<10x5xf32, #tpu.memory_space<vmem>>, %arg6: memref<1x5xf32, #tpu.memory_space<vmem>>, %arg7: memref<1x8x5xf32, #tpu.memory_space<vmem>>, %arg8: memref<8x40xf32, #tpu.memory_space<vmem>>, %arg9: memref<8x10xf32, #tpu.memory_space<vmem>>) attributes {dimension_semantics = [#tpu.dimension_semantics<parallel>], iteration_bounds = array<i64: 2>, scalar_prefetch = 0 : i64, scratch_operands = 2 : i64, tpu.core_type = #tpu.core_type<tc>, window_params = [{transform_indices = @transform_0, window_bounds = array<i64: 1, 8, 4>}, {pipeline_mode = #tpu.pipeline_mode<synchronous>, transform_indices = @transform_1, window_bounds = array<i64: 4, 40>}, {pipeline_mode = #tpu.pipeline_mode<synchronous>, transform_indices = @transform_2, window_bounds = array<i64: 10, 40>}, {pipeline_mode = #tpu.pipeline_mode<synchronous>, transform_indices = @transform_3, window_bounds = array<i64: 1, 40>}, {pipeline_mode = #tpu.pipeline_mode<synchronous>, transform_indices = @transform_4, window_bounds = array<i64: 10, 5>}, {pipeline_mode = #tpu.pipeline_mode<synchronous>, transform_indices = @transform_5, window_bounds = array<i64: 1, 5>}, {transform_indices = @transform_6, window_bounds = array<i64: 1, 8, 5>}]} {
    %c0 = arith.constant 0 : index
    %c0_0 = arith.constant 0 : index
    %c0_1 = arith.constant 0 : index
    %0 = vector.load %arg1[%c0, %c0_0, %c0_1] : memref<1x8x4xf32, #tpu.memory_space<vmem>>, vector<1x8x4xf32>
    %1 = vector.shape_cast %0 : vector<1x8x4xf32> to vector<8x4xf32>
    %c0_2 = arith.constant 0 : index
    %c0_3 = arith.constant 0 : index
    %2 = vector.load %arg2[%c0_2, %c0_3] : memref<4x40xf32, #tpu.memory_space<vmem>>, vector<4x40xf32>
    %cst = arith.constant dense<0.000000e+00> : vector<8x40xf32>
    %3 = tpu.matmul %1, %2, %cst {dimension_numbers = #tpu.dot_dimension_numbers<[1], [0], [0], [1], [0, 0, 1, 1], [], []>} : vector<8x4xf32>, vector<4x40xf32>, vector<8x40xf32> -> vector<8x40xf32>
    %c0_4 = arith.constant 0 : index
    %c0_5 = arith.constant 0 : index
    %4 = vector.load %arg4[%c0_4, %c0_5] : memref<1x40xf32, #tpu.memory_space<vmem>>, vector<1x40xf32>
    %5 = vector.broadcast %4 : vector<1x40xf32> to vector<8x40xf32>
    %6 = arith.addf %3, %5 : vector<8x40xf32>
    %c0_6 = arith.constant 0 : index
    %c0_7 = arith.constant 0 : index
    %7 = vector.load %arg8[%c0_6, %c0_7] : memref<8x40xf32, #tpu.memory_space<vmem>>, vector<8x40xf32>
    tpu.vector_store %arg8[%c0_6, %c0_7], %6 {strides = array<i32>} : memref<8x40xf32, #tpu.memory_space<vmem>>, vector<8x40xf32>,
    %c0_8 = arith.constant 0 : index
    %c0_9 = arith.constant 0 : index
    %8 = vector.load %arg3[%c0_8, %c0_9] : memref<10x40xf32, #tpu.memory_space<vmem>>, vector<10x40xf32>
    %cst_10 = arith.constant 0.000000e+00 : f32
    %9 = vector.broadcast %cst_10 : f32 to vector<1x10xf32>
    %cst_11 = arith.constant 0.000000e+00 : f32
    %10 = vector.broadcast %cst_11 : f32 to vector<1x10xf32>
    %c0_i32 = arith.constant 0 : i32
    %11 = arith.index_cast %c0_i32 : i32 to index
    %c0_12 = arith.constant 0 : index
    %12 = vector.load %arg8[%11, %c0_12] : memref<8x40xf32, #tpu.memory_space<vmem>>, vector<1x40xf32>
    %cst_13 = arith.constant dense<0.000000e+00> : vector<1x40xf32>
    %13 = tpu.matmul %9, %8, %cst_13 {dimension_numbers = #tpu.dot_dimension_numbers<[1], [0], [0], [1], [0, 0, 1, 1], [], []>} : vector<1x10xf32>, vector<10x40xf32>, vector<1x40xf32> -> vector<1x40xf32>
    %14 = arith.addf %12, %13 : vector<1x40xf32>
    %15 = vector.extract_strided_slice %14 {offsets = [0, 0], sizes = [1, 10], strides = [1, 1]} : vector<1x40xf32> to vector<1x10xf32>
    %16 = arith.negf %15 : vector<1x10xf32>
    %17 = math.exp %16 : vector<1x10xf32>
    %cst_14 = arith.constant 1.000000e+00 : f32
    %18 = vector.broadcast %cst_14 : f32 to vector<1x10xf32>
    %19 = arith.addf %18, %17 : vector<1x10xf32>
    %20 = arith.divf %18, %19 : vector<1x10xf32>
    %21 = vector.extract_strided_slice %14 {offsets = [0, 10], sizes = [1, 10], strides = [1, 1]} : vector<1x40xf32> to vector<1x10xf32>
    %22 = arith.negf %21 : vector<1x10xf32>
    %23 = math.exp %22 : vector<1x10xf32>
    %cst_15 = arith.constant 1.000000e+00 : f32
    %24 = vector.broadcast %cst_15 : f32 to vector<1x10xf32>
    %25 = arith.addf %24, %23 : vector<1x10xf32>
    %26 = arith.divf %24, %25 : vector<1x10xf32>
    %27 = vector.extract_strided_slice %14 {offsets = [0, 20], sizes = [1, 10], strides = [1, 1]} : vector<1x40xf32> to vector<1x10xf32>
    %28 = math.tanh %27 : vector<1x10xf32>
    %29 = vector.extract_strided_slice %14 {offsets = [0, 30], sizes = [1, 10], strides = [1, 1]} : vector<1x40xf32> to vector<1x10xf32>
    %30 = arith.negf %29 : vector<1x10xf32>
    %31 = math.exp %30 : vector<1x10xf32>
    %cst_16 = arith.constant 1.000000e+00 : f32
    %32 = vector.broadcast %cst_16 : f32 to vector<1x10xf32>
    %33 = arith.addf %32, %31 : vector<1x10xf32>
    %34 = arith.divf %32, %33 : vector<1x10xf32>
    %35 = arith.mulf %26, %10 : vector<1x10xf32>
    %36 = arith.mulf %20, %28 : vector<1x10xf32>
    %37 = arith.addf %35, %36 : vector<1x10xf32>
    %38 = math.tanh %37 : vector<1x10xf32>
    %39 = arith.mulf %34, %38 : vector<1x10xf32>
    %40 = arith.index_cast %c0_i32 : i32 to index
    %c0_17 = arith.constant 0 : index
    %41 = vector.load %arg9[%40, %c0_17] : memref<8x10xf32, #tpu.memory_space<vmem>>, vector<1x10xf32>
    tpu.vector_store %arg9[%40, %c0_17], %39 {strides = array<i32>} : memref<8x10xf32, #tpu.memory_space<vmem>>, vector<1x10xf32>,
    %c1_i32 = arith.constant 1 : i32
    %42 = arith.index_cast %c1_i32 : i32 to index
    %c0_18 = arith.constant 0 : index
    %43 = vector.load %arg8[%42, %c0_18] : memref<8x40xf32, #tpu.memory_space<vmem>>, vector<1x40xf32>
    %cst_19 = arith.constant dense<0.000000e+00> : vector<1x40xf32>
    %44 = tpu.matmul %39, %8, %cst_19 {dimension_numbers = #tpu.dot_dimension_numbers<[1], [0], [0], [1], [0, 0, 1, 1], [], []>} : vector<1x10xf32>, vector<10x40xf32>, vector<1x40xf32> -> vector<1x40xf32>
    %45 = arith.addf %43, %44 : vector<1x40xf32>
    %46 = vector.extract_strided_slice %45 {offsets = [0, 0], sizes = [1, 10], strides = [1, 1]} : vector<1x40xf32> to vector<1x10xf32>
    %47 = arith.negf %46 : vector<1x10xf32>
    %48 = math.exp %47 : vector<1x10xf32>
    %cst_20 = arith.constant 1.000000e+00 : f32
    %49 = vector.broadcast %cst_20 : f32 to vector<1x10xf32>
    %50 = arith.addf %49, %48 : vector<1x10xf32>
    %51 = arith.divf %49, %50 : vector<1x10xf32>
    %52 = vector.extract_strided_slice %45 {offsets = [0, 10], sizes = [1, 10], strides = [1, 1]} : vector<1x40xf32> to vector<1x10xf32>
    %53 = arith.negf %52 : vector<1x10xf32>
    %54 = math.exp %53 : vector<1x10xf32>
    %cst_21 = arith.constant 1.000000e+00 : f32
    %55 = vector.broadcast %cst_21 : f32 to vector<1x10xf32>
    %56 = arith.addf %55, %54 : vector<1x10xf32>
    %57 = arith.divf %55, %56 : vector<1x10xf32>
    %58 = vector.extract_strided_slice %45 {offsets = [0, 20], sizes = [1, 10], strides = [1, 1]} : vector<1x40xf32> to vector<1x10xf32>
    %59 = math.tanh %58 : vector<1x10xf32>
    %60 = vector.extract_strided_slice %45 {offsets = [0, 30], sizes = [1, 10], strides = [1, 1]} : vector<1x40xf32> to vector<1x10xf32>
    %61 = arith.negf %60 : vector<1x10xf32>
    %62 = math.exp %61 : vector<1x10xf32>
    %cst_22 = arith.constant 1.000000e+00 : f32
    %63 = vector.broadcast %cst_22 : f32 to vector<1x10xf32>
    %64 = arith.addf %63, %62 : vector<1x10xf32>
    %65 = arith.divf %63, %64 : vector<1x10xf32>
    %66 = arith.mulf %57, %37 : vector<1x10xf32>
    %67 = arith.mulf %51, %59 : vector<1x10xf32>
    %68 = arith.addf %66, %67 : vector<1x10xf32>
    %69 = math.tanh %68 : vector<1x10xf32>
    %70 = arith.mulf %65, %69 : vector<1x10xf32>
    %71 = arith.index_cast %c1_i32 : i32 to index
    %c0_23 = arith.constant 0 : index
    %72 = vector.load %arg9[%71, %c0_23] : memref<8x10xf32, #tpu.memory_space<vmem>>, vector<1x10xf32>
    tpu.vector_store %arg9[%71, %c0_23], %70 {strides = array<i32>} : memref<8x10xf32, #tpu.memory_space<vmem>>, vector<1x10xf32>,
    %c2_i32 = arith.constant 2 : i32
    %73 = arith.index_cast %c2_i32 : i32 to index
    %c0_24 = arith.constant 0 : index
    %74 = vector.load %arg8[%73, %c0_24] : memref<8x40xf32, #tpu.memory_space<vmem>>, vector<1x40xf32>
    %cst_25 = arith.constant dense<0.000000e+00> : vector<1x40xf32>
    %75 = tpu.matmul %70, %8, %cst_25 {dimension_numbers = #tpu.dot_dimension_numbers<[1], [0], [0], [1], [0, 0, 1, 1], [], []>} : vector<1x10xf32>, vector<10x40xf32>, vector<1x40xf32> -> vector<1x40xf32>
    %76 = arith.addf %74, %75 : vector<1x40xf32>
    %77 = vector.extract_strided_slice %76 {offsets = [0, 0], sizes = [1, 10], strides = [1, 1]} : vector<1x40xf32> to vector<1x10xf32>
    %78 = arith.negf %77 : vector<1x10xf32>
    %79 = math.exp %78 : vector<1x10xf32>
    %cst_26 = arith.constant 1.000000e+00 : f32
    %80 = vector.broadcast %cst_26 : f32 to vector<1x10xf32>
    %81 = arith.addf %80, %79 : vector<1x10xf32>
    %82 = arith.divf %80, %81 : vector<1x10xf32>
    %83 = vector.extract_strided_slice %76 {offsets = [0, 10], sizes = [1, 10], strides = [1, 1]} : vector<1x40xf32> to vector<1x10xf32>
    %84 = arith.negf %83 : vector<1x10xf32>
    %85 = math.exp %84 : vector<1x10xf32>
    %cst_27 = arith.constant 1.000000e+00 : f32
    %86 = vector.broadcast %cst_27 : f32 to vector<1x10xf32>
    %87 = arith.addf %86, %85 : vector<1x10xf32>
    %88 = arith.divf %86, %87 : vector<1x10xf32>
    %89 = vector.extract_strided_slice %76 {offsets = [0, 20], sizes = [1, 10], strides = [1, 1]} : vector<1x40xf32> to vector<1x10xf32>
    %90 = math.tanh %89 : vector<1x10xf32>
    %91 = vector.extract_strided_slice %76 {offsets = [0, 30], sizes = [1, 10], strides = [1, 1]} : vector<1x40xf32> to vector<1x10xf32>
    %92 = arith.negf %91 : vector<1x10xf32>
    %93 = math.exp %92 : vector<1x10xf32>
    %cst_28 = arith.constant 1.000000e+00 : f32
    %94 = vector.broadcast %cst_28 : f32 to vector<1x10xf32>
    %95 = arith.addf %94, %93 : vector<1x10xf32>
    %96 = arith.divf %94, %95 : vector<1x10xf32>
    %97 = arith.mulf %88, %68 : vector<1x10xf32>
    %98 = arith.mulf %82, %90 : vector<1x10xf32>
    %99 = arith.addf %97, %98 : vector<1x10xf32>
    %100 = math.tanh %99 : vector<1x10xf32>
    %101 = arith.mulf %96, %100 : vector<1x10xf32>
    %102 = arith.index_cast %c2_i32 : i32 to index
    %c0_29 = arith.constant 0 : index
    %103 = vector.load %arg9[%102, %c0_29] : memref<8x10xf32, #tpu.memory_space<vmem>>, vector<1x10xf32>
    tpu.vector_store %arg9[%102, %c0_29], %101 {strides = array<i32>} : memref<8x10xf32, #tpu.memory_space<vmem>>, vector<1x10xf32>,
    %c3_i32 = arith.constant 3 : i32
    %104 = arith.index_cast %c3_i32 : i32 to index
    %c0_30 = arith.constant 0 : index
    %105 = vector.load %arg8[%104, %c0_30] : memref<8x40xf32, #tpu.memory_space<vmem>>, vector<1x40xf32>
    %cst_31 = arith.constant dense<0.000000e+00> : vector<1x40xf32>
    %106 = tpu.matmul %101, %8, %cst_31 {dimension_numbers = #tpu.dot_dimension_numbers<[1], [0], [0], [1], [0, 0, 1, 1], [], []>} : vector<1x10xf32>, vector<10x40xf32>, vector<1x40xf32> -> vector<1x40xf32>
    %107 = arith.addf %105, %106 : vector<1x40xf32>
    %108 = vector.extract_strided_slice %107 {offsets = [0, 0], sizes = [1, 10], strides = [1, 1]} : vector<1x40xf32> to vector<1x10xf32>
    %109 = arith.negf %108 : vector<1x10xf32>
    %110 = math.exp %109 : vector<1x10xf32>
    %cst_32 = arith.constant 1.000000e+00 : f32
    %111 = vector.broadcast %cst_32 : f32 to vector<1x10xf32>
    %112 = arith.addf %111, %110 : vector<1x10xf32>
    %113 = arith.divf %111, %112 : vector<1x10xf32>
    %114 = vector.extract_strided_slice %107 {offsets = [0, 10], sizes = [1, 10], strides = [1, 1]} : vector<1x40xf32> to vector<1x10xf32>
    %115 = arith.negf %114 : vector<1x10xf32>
    %116 = math.exp %115 : vector<1x10xf32>
    %cst_33 = arith.constant 1.000000e+00 : f32
    %117 = vector.broadcast %cst_33 : f32 to vector<1x10xf32>
    %118 = arith.addf %117, %116 : vector<1x10xf32>
    %119 = arith.divf %117, %118 : vector<1x10xf32>
    %120 = vector.extract_strided_slice %107 {offsets = [0, 20], sizes = [1, 10], strides = [1, 1]} : vector<1x40xf32> to vector<1x10xf32>
    %121 = math.tanh %120 : vector<1x10xf32>
    %122 = vector.extract_strided_slice %107 {offsets = [0, 30], sizes = [1, 10], strides = [1, 1]} : vector<1x40xf32> to vector<1x10xf32>
    %123 = arith.negf %122 : vector<1x10xf32>
    %124 = math.exp %123 : vector<1x10xf32>
    %cst_34 = arith.constant 1.000000e+00 : f32
    %125 = vector.broadcast %cst_34 : f32 to vector<1x10xf32>
    %126 = arith.addf %125, %124 : vector<1x10xf32>
    %127 = arith.divf %125, %126 : vector<1x10xf32>
    %128 = arith.mulf %119, %99 : vector<1x10xf32>
    %129 = arith.mulf %113, %121 : vector<1x10xf32>
    %130 = arith.addf %128, %129 : vector<1x10xf32>
    %131 = math.tanh %130 : vector<1x10xf32>
    %132 = arith.mulf %127, %131 : vector<1x10xf32>
    %133 = arith.index_cast %c3_i32 : i32 to index
    %c0_35 = arith.constant 0 : index
    %134 = vector.load %arg9[%133, %c0_35] : memref<8x10xf32, #tpu.memory_space<vmem>>, vector<1x10xf32>
    tpu.vector_store %arg9[%133, %c0_35], %132 {strides = array<i32>} : memref<8x10xf32, #tpu.memory_space<vmem>>, vector<1x10xf32>,
    %c4_i32 = arith.constant 4 : i32
    %135 = arith.index_cast %c4_i32 : i32 to index
    %c0_36 = arith.constant 0 : index
    %136 = vector.load %arg8[%135, %c0_36] : memref<8x40xf32, #tpu.memory_space<vmem>>, vector<1x40xf32>
    %cst_37 = arith.constant dense<0.000000e+00> : vector<1x40xf32>
    %137 = tpu.matmul %132, %8, %cst_37 {dimension_numbers = #tpu.dot_dimension_numbers<[1], [0], [0], [1], [0, 0, 1, 1], [], []>} : vector<1x10xf32>, vector<10x40xf32>, vector<1x40xf32> -> vector<1x40xf32>
    %138 = arith.addf %136, %137 : vector<1x40xf32>
    %139 = vector.extract_strided_slice %138 {offsets = [0, 0], sizes = [1, 10], strides = [1, 1]} : vector<1x40xf32> to vector<1x10xf32>
    %140 = arith.negf %139 : vector<1x10xf32>
    %141 = math.exp %140 : vector<1x10xf32>
    %cst_38 = arith.constant 1.000000e+00 : f32
    %142 = vector.broadcast %cst_38 : f32 to vector<1x10xf32>
    %143 = arith.addf %142, %141 : vector<1x10xf32>
    %144 = arith.divf %142, %143 : vector<1x10xf32>
    %145 = vector.extract_strided_slice %138 {offsets = [0, 10], sizes = [1, 10], strides = [1, 1]} : vector<1x40xf32> to vector<1x10xf32>
    %146 = arith.negf %145 : vector<1x10xf32>
    %147 = math.exp %146 : vector<1x10xf32>
    %cst_39 = arith.constant 1.000000e+00 : f32
    %148 = vector.broadcast %cst_39 : f32 to vector<1x10xf32>
    %149 = arith.addf %148, %147 : vector<1x10xf32>
    %150 = arith.divf %148, %149 : vector<1x10xf32>
    %151 = vector.extract_strided_slice %138 {offsets = [0, 20], sizes = [1, 10], strides = [1, 1]} : vector<1x40xf32> to vector<1x10xf32>
    %152 = math.tanh %151 : vector<1x10xf32>
    %153 = vector.extract_strided_slice %138 {offsets = [0, 30], sizes = [1, 10], strides = [1, 1]} : vector<1x40xf32> to vector<1x10xf32>
    %154 = arith.negf %153 : vector<1x10xf32>
    %155 = math.exp %154 : vector<1x10xf32>
    %cst_40 = arith.constant 1.000000e+00 : f32
    %156 = vector.broadcast %cst_40 : f32 to vector<1x10xf32>
    %157 = arith.addf %156, %155 : vector<1x10xf32>
    %158 = arith.divf %156, %157 : vector<1x10xf32>
    %159 = arith.mulf %150, %130 : vector<1x10xf32>
    %160 = arith.mulf %144, %152 : vector<1x10xf32>
    %161 = arith.addf %159, %160 : vector<1x10xf32>
    %162 = math.tanh %161 : vector<1x10xf32>
    %163 = arith.mulf %158, %162 : vector<1x10xf32>
    %164 = arith.index_cast %c4_i32 : i32 to index
    %c0_41 = arith.constant 0 : index
    %165 = vector.load %arg9[%164, %c0_41] : memref<8x10xf32, #tpu.memory_space<vmem>>, vector<1x10xf32>
    tpu.vector_store %arg9[%164, %c0_41], %163 {strides = array<i32>} : memref<8x10xf32, #tpu.memory_space<vmem>>, vector<1x10xf32>,
    %c5_i32 = arith.constant 5 : i32
    %166 = arith.index_cast %c5_i32 : i32 to index
    %c0_42 = arith.constant 0 : index
    %167 = vector.load %arg8[%166, %c0_42] : memref<8x40xf32, #tpu.memory_space<vmem>>, vector<1x40xf32>
    %cst_43 = arith.constant dense<0.000000e+00> : vector<1x40xf32>
    %168 = tpu.matmul %163, %8, %cst_43 {dimension_numbers = #tpu.dot_dimension_numbers<[1], [0], [0], [1], [0, 0, 1, 1], [], []>} : vector<1x10xf32>, vector<10x40xf32>, vector<1x40xf32> -> vector<1x40xf32>
    %169 = arith.addf %167, %168 : vector<1x40xf32>
    %170 = vector.extract_strided_slice %169 {offsets = [0, 0], sizes = [1, 10], strides = [1, 1]} : vector<1x40xf32> to vector<1x10xf32>
    %171 = arith.negf %170 : vector<1x10xf32>
    %172 = math.exp %171 : vector<1x10xf32>
    %cst_44 = arith.constant 1.000000e+00 : f32
    %173 = vector.broadcast %cst_44 : f32 to vector<1x10xf32>
    %174 = arith.addf %173, %172 : vector<1x10xf32>
    %175 = arith.divf %173, %174 : vector<1x10xf32>
    %176 = vector.extract_strided_slice %169 {offsets = [0, 10], sizes = [1, 10], strides = [1, 1]} : vector<1x40xf32> to vector<1x10xf32>
    %177 = arith.negf %176 : vector<1x10xf32>
    %178 = math.exp %177 : vector<1x10xf32>
    %cst_45 = arith.constant 1.000000e+00 : f32
    %179 = vector.broadcast %cst_45 : f32 to vector<1x10xf32>
    %180 = arith.addf %179, %178 : vector<1x10xf32>
    %181 = arith.divf %179, %180 : vector<1x10xf32>
    %182 = vector.extract_strided_slice %169 {offsets = [0, 20], sizes = [1, 10], strides = [1, 1]} : vector<1x40xf32> to vector<1x10xf32>
    %183 = math.tanh %182 : vector<1x10xf32>
    %184 = vector.extract_strided_slice %169 {offsets = [0, 30], sizes = [1, 10], strides = [1, 1]} : vector<1x40xf32> to vector<1x10xf32>
    %185 = arith.negf %184 : vector<1x10xf32>
    %186 = math.exp %185 : vector<1x10xf32>
    %cst_46 = arith.constant 1.000000e+00 : f32
    %187 = vector.broadcast %cst_46 : f32 to vector<1x10xf32>
    %188 = arith.addf %187, %186 : vector<1x10xf32>
    %189 = arith.divf %187, %188 : vector<1x10xf32>
    %190 = arith.mulf %181, %161 : vector<1x10xf32>
    %191 = arith.mulf %175, %183 : vector<1x10xf32>
    %192 = arith.addf %190, %191 : vector<1x10xf32>
    %193 = math.tanh %192 : vector<1x10xf32>
    %194 = arith.mulf %189, %193 : vector<1x10xf32>
    %195 = arith.index_cast %c5_i32 : i32 to index
    %c0_47 = arith.constant 0 : index
    %196 = vector.load %arg9[%195, %c0_47] : memref<8x10xf32, #tpu.memory_space<vmem>>, vector<1x10xf32>
    tpu.vector_store %arg9[%195, %c0_47], %194 {strides = array<i32>} : memref<8x10xf32, #tpu.memory_space<vmem>>, vector<1x10xf32>,
    %c6_i32 = arith.constant 6 : i32
    %197 = arith.index_cast %c6_i32 : i32 to index
    %c0_48 = arith.constant 0 : index
    %198 = vector.load %arg8[%197, %c0_48] : memref<8x40xf32, #tpu.memory_space<vmem>>, vector<1x40xf32>
    %cst_49 = arith.constant dense<0.000000e+00> : vector<1x40xf32>
    %199 = tpu.matmul %194, %8, %cst_49 {dimension_numbers = #tpu.dot_dimension_numbers<[1], [0], [0], [1], [0, 0, 1, 1], [], []>} : vector<1x10xf32>, vector<10x40xf32>, vector<1x40xf32> -> vector<1x40xf32>
    %200 = arith.addf %198, %199 : vector<1x40xf32>
    %201 = vector.extract_strided_slice %200 {offsets = [0, 0], sizes = [1, 10], strides = [1, 1]} : vector<1x40xf32> to vector<1x10xf32>
    %202 = arith.negf %201 : vector<1x10xf32>
    %203 = math.exp %202 : vector<1x10xf32>
    %cst_50 = arith.constant 1.000000e+00 : f32
    %204 = vector.broadcast %cst_50 : f32 to vector<1x10xf32>
    %205 = arith.addf %204, %203 : vector<1x10xf32>
    %206 = arith.divf %204, %205 : vector<1x10xf32>
    %207 = vector.extract_strided_slice %200 {offsets = [0, 10], sizes = [1, 10], strides = [1, 1]} : vector<1x40xf32> to vector<1x10xf32>
    %208 = arith.negf %207 : vector<1x10xf32>
    %209 = math.exp %208 : vector<1x10xf32>
    %cst_51 = arith.constant 1.000000e+00 : f32
    %210 = vector.broadcast %cst_51 : f32 to vector<1x10xf32>
    %211 = arith.addf %210, %209 : vector<1x10xf32>
    %212 = arith.divf %210, %211 : vector<1x10xf32>
    %213 = vector.extract_strided_slice %200 {offsets = [0, 20], sizes = [1, 10], strides = [1, 1]} : vector<1x40xf32> to vector<1x10xf32>
    %214 = math.tanh %213 : vector<1x10xf32>
    %215 = vector.extract_strided_slice %200 {offsets = [0, 30], sizes = [1, 10], strides = [1, 1]} : vector<1x40xf32> to vector<1x10xf32>
    %216 = arith.negf %215 : vector<1x10xf32>
    %217 = math.exp %216 : vector<1x10xf32>
    %cst_52 = arith.constant 1.000000e+00 : f32
    %218 = vector.broadcast %cst_52 : f32 to vector<1x10xf32>
    %219 = arith.addf %218, %217 : vector<1x10xf32>
    %220 = arith.divf %218, %219 : vector<1x10xf32>
    %221 = arith.mulf %212, %192 : vector<1x10xf32>
    %222 = arith.mulf %206, %214 : vector<1x10xf32>
    %223 = arith.addf %221, %222 : vector<1x10xf32>
    %224 = math.tanh %223 : vector<1x10xf32>
    %225 = arith.mulf %220, %224 : vector<1x10xf32>
    %226 = arith.index_cast %c6_i32 : i32 to index
    %c0_53 = arith.constant 0 : index
    %227 = vector.load %arg9[%226, %c0_53] : memref<8x10xf32, #tpu.memory_space<vmem>>, vector<1x10xf32>
    tpu.vector_store %arg9[%226, %c0_53], %225 {strides = array<i32>} : memref<8x10xf32, #tpu.memory_space<vmem>>, vector<1x10xf32>,
    %c7_i32 = arith.constant 7 : i32
    %228 = arith.index_cast %c7_i32 : i32 to index
    %c0_54 = arith.constant 0 : index
    %229 = vector.load %arg8[%228, %c0_54] : memref<8x40xf32, #tpu.memory_space<vmem>>, vector<1x40xf32>
    %cst_55 = arith.constant dense<0.000000e+00> : vector<1x40xf32>
    %230 = tpu.matmul %225, %8, %cst_55 {dimension_numbers = #tpu.dot_dimension_numbers<[1], [0], [0], [1], [0, 0, 1, 1], [], []>} : vector<1x10xf32>, vector<10x40xf32>, vector<1x40xf32> -> vector<1x40xf32>
    %231 = arith.addf %229, %230 : vector<1x40xf32>
    %232 = vector.extract_strided_slice %231 {offsets = [0, 0], sizes = [1, 10], strides = [1, 1]} : vector<1x40xf32> to vector<1x10xf32>
    %233 = arith.negf %232 : vector<1x10xf32>
    %234 = math.exp %233 : vector<1x10xf32>
    %cst_56 = arith.constant 1.000000e+00 : f32
    %235 = vector.broadcast %cst_56 : f32 to vector<1x10xf32>
    %236 = arith.addf %235, %234 : vector<1x10xf32>
    %237 = arith.divf %235, %236 : vector<1x10xf32>
    %238 = vector.extract_strided_slice %231 {offsets = [0, 10], sizes = [1, 10], strides = [1, 1]} : vector<1x40xf32> to vector<1x10xf32>
    %239 = arith.negf %238 : vector<1x10xf32>
    %240 = math.exp %239 : vector<1x10xf32>
    %cst_57 = arith.constant 1.000000e+00 : f32
    %241 = vector.broadcast %cst_57 : f32 to vector<1x10xf32>
    %242 = arith.addf %241, %240 : vector<1x10xf32>
    %243 = arith.divf %241, %242 : vector<1x10xf32>
    %244 = vector.extract_strided_slice %231 {offsets = [0, 20], sizes = [1, 10], strides = [1, 1]} : vector<1x40xf32> to vector<1x10xf32>
    %245 = math.tanh %244 : vector<1x10xf32>
    %246 = vector.extract_strided_slice %231 {offsets = [0, 30], sizes = [1, 10], strides = [1, 1]} : vector<1x40xf32> to vector<1x10xf32>
    %247 = arith.negf %246 : vector<1x10xf32>
    %248 = math.exp %247 : vector<1x10xf32>
    %cst_58 = arith.constant 1.000000e+00 : f32
    %249 = vector.broadcast %cst_58 : f32 to vector<1x10xf32>
    %250 = arith.addf %249, %248 : vector<1x10xf32>
    %251 = arith.divf %249, %250 : vector<1x10xf32>
    %252 = arith.mulf %243, %223 : vector<1x10xf32>
    %253 = arith.mulf %237, %245 : vector<1x10xf32>
    %254 = arith.addf %252, %253 : vector<1x10xf32>
    %255 = math.tanh %254 : vector<1x10xf32>
    %256 = arith.mulf %251, %255 : vector<1x10xf32>
    %257 = arith.index_cast %c7_i32 : i32 to index
    %c0_59 = arith.constant 0 : index
    %258 = vector.load %arg9[%257, %c0_59] : memref<8x10xf32, #tpu.memory_space<vmem>>, vector<1x10xf32>
    tpu.vector_store %arg9[%257, %c0_59], %256 {strides = array<i32>} : memref<8x10xf32, #tpu.memory_space<vmem>>, vector<1x10xf32>,
    %c8_i32 = arith.constant 8 : i32
    %c0_60 = arith.constant 0 : index
    %c0_61 = arith.constant 0 : index
    %259 = vector.load %arg9[%c0_60, %c0_61] : memref<8x10xf32, #tpu.memory_space<vmem>>, vector<8x10xf32>
    %c0_62 = arith.constant 0 : index
    %c0_63 = arith.constant 0 : index
    %260 = vector.load %arg5[%c0_62, %c0_63] : memref<10x5xf32, #tpu.memory_space<vmem>>, vector<10x5xf32>
    %cst_64 = arith.constant dense<0.000000e+00> : vector<8x5xf32>
    %261 = tpu.matmul %259, %260, %cst_64 {dimension_numbers = #tpu.dot_dimension_numbers<[1], [0], [0], [1], [0, 0, 1, 1], [], []>} : vector<8x10xf32>, vector<10x5xf32>, vector<8x5xf32> -> vector<8x5xf32>
    %c0_65 = arith.constant 0 : index
    %c0_66 = arith.constant 0 : index
    %262 = vector.load %arg6[%c0_65, %c0_66] : memref<1x5xf32, #tpu.memory_space<vmem>>, vector<1x5xf32>
    %263 = vector.broadcast %262 : vector<1x5xf32> to vector<8x5xf32>
    %264 = arith.addf %261, %263 : vector<8x5xf32>
    %c0_67 = arith.constant 0 : index
    %c0_68 = arith.constant 0 : index
    %c0_69 = arith.constant 0 : index
    %265 = vector.load %arg7[%c0_67, %c0_68, %c0_69] : memref<1x8x5xf32, #tpu.memory_space<vmem>>, vector<1x8x5xf32>
    %266 = vector.shape_cast %265 : vector<1x8x5xf32> to vector<8x5xf32>
    %267 = vector.shape_cast %264 : vector<8x5xf32> to vector<1x8x5xf32>
    tpu.vector_store %arg7[%c0_67, %c0_68, %c0_69], %267 {strides = array<i32>} : memref<1x8x5xf32, #tpu.memory_space<vmem>>, vector<1x8x5xf32>,
    return
  }
  func.func @transform_0(%arg0: i32) -> (i32, i32, i32) {
    %c0_i32 = arith.constant 0 : i32
    %c0_i32_0 = arith.constant 0 : i32
    %c0_i32_1 = arith.constant 0 : i32
    return %arg0, %c0_i32, %c0_i32_0 : i32, i32, i32
  }
  func.func @transform_1(%arg0: i32) -> (i32, i32) {
    %c0_i32 = arith.constant 0 : i32
    %c0_i32_0 = arith.constant 0 : i32
    %c0_i32_1 = arith.constant 0 : i32
    return %c0_i32, %c0_i32_0 : i32, i32
  }
  func.func @transform_2(%arg0: i32) -> (i32, i32) {
    %c0_i32 = arith.constant 0 : i32
    %c0_i32_0 = arith.constant 0 : i32
    %c0_i32_1 = arith.constant 0 : i32
    return %c0_i32, %c0_i32_0 : i32, i32
  }
  func.func @transform_3(%arg0: i32) -> (i32, i32) {
    %c0_i32 = arith.constant 0 : i32
    %c0_i32_0 = arith.constant 0 : i32
    %c0_i32_1 = arith.constant 0 : i32
    return %c0_i32, %c0_i32_0 : i32, i32
  }
  func.func @transform_4(%arg0: i32) -> (i32, i32) {
    %c0_i32 = arith.constant 0 : i32
    %c0_i32_0 = arith.constant 0 : i32
    %c0_i32_1 = arith.constant 0 : i32
    return %c0_i32, %c0_i32_0 : i32, i32
  }
  func.func @transform_5(%arg0: i32) -> (i32, i32) {
    %c0_i32 = arith.constant 0 : i32
    %c0_i32_0 = arith.constant 0 : i32
    %c0_i32_1 = arith.constant 0 : i32
    return %c0_i32, %c0_i32_0 : i32, i32
  }
  func.func @transform_6(%arg0: i32) -> (i32, i32, i32) {
    %c0_i32 = arith.constant 0 : i32
    %c0_i32_0 = arith.constant 0 : i32
    %c0_i32_1 = arith.constant 0 : i32
    return %arg0, %c0_i32, %c0_i32_0 : i32, i32, i32
  }
}

</mosaic_0001>

<bundles_post_ra>
// kernel: tpu_custom_call.1
= control target key start
LH: loop header
LB: loop body
LE: loop exit
PB: predicated region body
PF: predicated region fallthrough
CT: control target
= control target key end

     0   :  { %s1612_s21 = smov 0   ;;  %s1768_s0 = inlined_call_operand.vmem [shape: f32[2,8,4], index: 0, kind: input, shape index: {}]   ;;  %s1769_s1 = inlined_call_operand.vmem [shape: f32[4,40], index: 1, kind: input, shape index: {}]   ;;  %s1770_s2 = inlined_call_operand.vmem [shape: f32[10,40], index: 2, kind: input, shape index: {}]   ;;  %s1771_s3 = inlined_call_operand.vmem [shape: f32[1,40], index: 3, kind: input, shape index: {}]   ;;  %s1772_s4 = inlined_call_operand.vmem [shape: f32[10,5], index: 4, kind: input, shape index: {}]   ;;  %s1773_s5 = inlined_call_operand.vmem [shape: f32[1,5], index: 5, kind: input, shape index: {}]   ;;  %s1774_s6 = inlined_call_operand.vmem [shape: f32[2,8,5], index: 6, kind: output, shape index: {}]  }
   0x1 LB: > { %s1310_s22 = sadd.s32 4294967295, %s1567_s21   ;;  %p1314_p0 = scmp.ge.s32.totalorder %s1567_s21, 1  ;;  %s1567_s21 = sphi %s1612_s21, %s16_s21  }
   0x2   : > { %p211_p1 = scmp.lt.s32.totalorder %s1567_s21, 3 }
   0x4   : > { %p212_p2 = pnand %p1314_p0, %p211_p1 }
   0x5   : > { %v248_v0 = vld [vmem:[%s1769_s1] sm:$0xf] (!%p212_p2)  ;;  %vm260_vm0 = vcmask (!%p212_p2), 1043456   ;;  %p239_p3 = scmp.lt.s32.totalorder (!%p212_p2), %s1310_s22, 1  ;;  %v1569_v1 = vmov (!%p212_p2), 0.0   ;;  %vm1570_vm1 = vmmov (!%p212_p2), 0  }
   0x6   : > { %215 = sbr.rel (%p212_p2) target bundleno = 5866 (0x16ea), region = 44  ;;  %1377 = vmatprep.subr.mxu0 (!%p212_p2), %v1569_v1  ;;  %1379 = vmatprep.mubr.msk.f32.mxu0 (!%p212_p2), %vm1570_vm1, %v1569_v1  ;;  %v336_v2 = vld [vmem:[%s1770_s2] sm:$0xff] (!%p212_p2)  ;;  %v337_v3 = vld [vmem:[%s1770_s2 + $0x8] sm:$0x3] (!%p212_p2)  ;;  %vm343_vm2 = vcmask (!%p212_p2), 1041408   ;;  %v1571_v4 = vmov (!%p212_p2), 0.0|0.0  }
   0x7   : > { %1378 = vmatpush3.msk.msra.mxu0 (!%p212_p2), %vm260_vm0, %v248_v0  ;;  %1445 = vmatprep.subr.bf16.mxu1 (!%p212_p2), %v1571_v4  ;;  %v1635_v5 = vpack.c.bf16 (!%p212_p2), %v337_v3, %v336_v2  ;;  %vm1572_vm3 = vmmov (!%p212_p2), 1   ;;  %vm256_vm5 = vcmask (!%p212_p2), 31744   ;;  %v1317_v8 = vld [vmem:[%s1771_s3] ss:$0 sm:$0xff] (!%p212_p2)  ;;  %vm334_vm6 = vcmask (!%p212_p2), 326656   ;;  %s1573_s11 = smov (!%p212_p2), 108  }
   0x8   : > { %vm1637_vm4 = vmpackc.low (!%p212_p2), %vm343_vm2, %vm1572_vm3  ;;  %1386 = vmatprep.mubr.msk.f32.mxu1 (!%p212_p2), %vm1570_vm1, %v1569_v1  ;;  %1449 = vmatprep.subr.bf16.mxu0 (!%p212_p2), %v1571_v4  ;;  %s1574_s12 = smov (!%p212_p2), 10   ;;  %s1575_s13 = smov (!%p212_p2), 20   ;;  %vm446_vm7 = vcmask (!%p212_p2), 73728   ;;  %vm339_vm8 = vcmask (!%p212_p2), 80896   ;;  %vm1255_vm9 = vcmask (!%p212_p2), 39936  }
   0x9   : > { %1448 = vmatpush3.bf16.msk.msra.mxu1 (!%p212_p2), %vm1637_vm4, %v1635_v5  ;;  %s1576_s14 = smov (!%p212_p2), 98  }
   0xa   : > { %1453 = vmatprep.subr.bf16.mxu1 (!%p212_p2), %v1571_v4 }
   0xc   : > { %1387 = vmatmul.mubr.f32.vlgmr.msra.gmra.mrb[0].mxu1 (!%p212_p2), %v1569_v1 }
   0xd   : > { %s1778_s22 = smov (!%p239_p3, %s1310_s22), 1  ;;  %1456 = vmatpush3.bf16.msk.msra.mxu1 %vm1637_vm4, %v1635_v5  ;;  %1400 = vmatprep.mubr.msk.f32.mxu1 %vm1570_vm1, %v1569_v1 }
   0xe   : > { %s1315_s29 = sshll.u32 %s1778_s22, 3  ;;  %1461 = vmatprep.subr.bf16.mxu1 %v1571_v4 }
   0xf   : > { %s242_s8 = scalar_lea.vmem %s1768_s0, %s1315_s29  ;;  %s246_s25 = scalar_lea.vmem %s1774_s6, %s1315_s29 }
  0x10   : > { %v247_v7 = vld [vmem:[%s242_s8] sm:$0xff] }
  0x11   : > { %1380 = vmatmul.mubr.msk.f32.vlgmr.msra.gmra.mrb[0].mxu0 %vm256_vm5, %v247_v7 }
  0x12   : > { %1452 = vmatpush3.bf16.msk.msra.mxu0 %vm1637_vm4, %v1635_v5  ;;  %1393 = vmatprep.mubr.msk.f32.mxu0 %vm1570_vm1, %v1569_v1 }
  0x13   : > { %1457 = vmatprep.subr.bf16.mxu0 %v1571_v4 }
  0xdf   : > { %v413_v10 = vpop.f32.mrb[0].mxu1 }
  0xe0   : > { %v1388_v13 = vpop.f32.mrb[1].mxu1 }
  0xe4   : > { %v330_v9 = vpop.f32.mrb[0].mxu0 }
  0xe5   : > { %v331_v11 = vadd.f32 %v1317_v8, %v330_v9  ;;  %v1381_v12 = vpop.f32.mrb[1].mxu0 }
  0xe7   : > { %335 = vst.msk [vmem:[#allocation2] sm:$0xff] %vm334_vm6, %v331_v11 }
  0xee   : > { %v338_v14 = vld [vmem:[#allocation2] sm:$0x1]  ;;  %v448_v30 = vld [vmem:[#allocation2 + $0x1] sm:$0x1]  ;;  %v551_v48 = vld [vmem:[#allocation2 + $0x2] sm:$0x1] }
  0xef   : > { %v417_v15 = vadd.f32 %v413_v10, %v338_v14  ;;  %v654_v3 = vld [vmem:[#allocation2 + $0x3] sm:$0x1] }
  0xf1   : > { %1497 = vtanh.f32 %v417_v15  ;;  %v1321_v17 = vmul.f32 -1.442695, %v417_v15 }
  0xf3   : > { %1499 = vpow2.f32 %v1321_v17 }
  0xfb   : > { %v1498_v16 = vpop.eup %1497 }
  0xfc   : > { %427 = vrot.lane.b32.xlu0 %v1498_v16, %s1573_s11 }
  0xfd   : > { %v1500_v18 = vpop.eup %1499 }
  0xfe   : > { %v421_v19 = vadd.f32 1.0, %v1500_v18 }
 0x100   : > { %1501 = vrcp.f32 %v421_v19 }
 0x10a   : > { %v1502_v20 = vpop.eup %1501 }
 0x10b   : > { %v425_v23 = vmul.f32 0.0, %v1502_v20 }
 0x16e   : > { %v428_v21 = vpop.permute.xlu0 %427 }
 0x16f   : > { %v430_v22 = vmul.f32 %v1502_v20, %v428_v21 }
 0x171   : > { %432 = vrot.lane.b32.xlu0 %v430_v22, %s1574_s12 }
 0x1e3   : > { %v433_v24 = vpop.permute.xlu0 %432 }
 0x1e4   : > { %v435_v25 = vadd.f32 %v433_v24, %v425_v23  ;;  %v757_v24 = vld [vmem:[#allocation2 + $0x4] sm:$0x1] }
 0x1e6   : > { %1503 = vtanh.f32 %v435_v25 }
 0x1f0   : > { %v1504_v26 = vpop.eup %1503 }
 0x1f1   : > { %438 = vrot.lane.b32.xlu1 %v1504_v26, %s1575_s13 }
 0x263   : > { %v439_v27 = vpop.permute.xlu1 %438 }
 0x264   : > { %v441_v28 = vmul.f32 %v1502_v20, %v439_v27 }
 0x266   : > { %443 = vrot.lane.b32.xlu1 %v441_v28, %s1576_s14 }
 0x2d8   : > { %v444_v29 = vpop.permute.xlu1 %443 }
 0x2d9   : > { %447 = vst.msk [vmem:[#allocation3] sm:$0x1] %vm446_vm7, %v444_v29  ;;  %1394 = vmatmul.mubr.msk.f32.vlgmr.msra.gmra.mrb[2].mxu0 %vm339_vm8, %v444_v29 }
 0x2da   : > { %1460 = vmatpush3.bf16.msk.msra.mxu0 %vm1637_vm4, %v1635_v5  ;;  %1407 = vmatprep.mubr.msk.f32.mxu0 %vm1570_vm1, %v1569_v1 }
 0x2db   : > { %1465 = vmatprep.subr.bf16.mxu0 %v1571_v4 }
 0x3ac   : > { %v517_v31 = vpop.f32.mrb[2].mxu0 }
 0x3ad   : > { %v521_v32 = vadd.f32 %v517_v31, %v448_v30  ;;  %v1395_v33 = vpop.f32.mrb[3].mxu0 }
 0x3af   : > { %1505 = vtanh.f32 %v521_v32  ;;  %v1324_v35 = vmul.f32 -1.442695, %v521_v32 }
 0x3b1   : > { %1507 = vpow2.f32 %v1324_v35 }
 0x3b9   : > { %v1506_v34 = vpop.eup %1505 }
 0x3ba   : > { %531 = vrot.lane.b32.xlu0 %v1506_v34, %s1573_s11 }
 0x3bb   : > { %v1508_v36 = vpop.eup %1507 }
 0x3bc   : > { %v525_v37 = vadd.f32 1.0, %v1508_v36 }
 0x3be   : > { %1509 = vrcp.f32 %v525_v37 }
 0x3c8   : > { %v1510_v38 = vpop.eup %1509 }
 0x3c9   : > { %v529_v41 = vmul.f32 %v1510_v38, %v435_v25 }
 0x42c   : > { %v532_v39 = vpop.permute.xlu0 %531 }
 0x42d   : > { %v534_v40 = vmul.f32 %v1510_v38, %v532_v39 }
 0x42f   : > { %536 = vrot.lane.b32.xlu1 %v534_v40, %s1574_s12 }
 0x4a1   : > { %v537_v42 = vpop.permute.xlu1 %536 }
 0x4a2   : > { %v539_v43 = vadd.f32 %v537_v42, %v529_v41  ;;  %v860_v41 = vld [vmem:[#allocation2 + $0x5] sm:$0x1] }
 0x4a4   : > { %1511 = vtanh.f32 %v539_v43 }
 0x4ae   : > { %v1512_v44 = vpop.eup %1511 }
 0x4af   : > { %542 = vrot.lane.b32.xlu0 %v1512_v44, %s1575_s13 }
 0x521   : > { %v543_v45 = vpop.permute.xlu0 %542 }
 0x522   : > { %v545_v46 = vmul.f32 %v1510_v38, %v543_v45 }
 0x524   : > { %547 = vrot.lane.b32.xlu1 %v545_v46, %s1576_s14 }
 0x596   : > { %v548_v47 = vpop.permute.xlu1 %547 }
 0x597   : > { %550 = vst.msk [vmem:[#allocation3 + $0x1] sm:$0x1] %vm446_vm7, %v548_v47  ;;  %1401 = vmatmul.mubr.msk.f32.vlgmr.msra.gmra.mrb[2].mxu1 %vm339_vm8, %v548_v47 }
 0x598   : > { %1464 = vmatpush3.bf16.msk.msra.mxu1 %vm1637_vm4, %v1635_v5  ;;  %1414 = vmatprep.mubr.msk.f32.mxu1 %vm1570_vm1, %v1569_v1 }
 0x599   : > { %1469 = vmatprep.subr.bf16.mxu1 %v1571_v4 }
 0x66a   : > { %v620_v49 = vpop.f32.mrb[2].mxu1 }
 0x66b   : > { %v624_v50 = vadd.f32 %v620_v49, %v551_v48  ;;  %v1402_v51 = vpop.f32.mrb[3].mxu1 }
 0x66d   : > { %1513 = vtanh.f32 %v624_v50  ;;  %v1327_v53 = vmul.f32 -1.442695, %v624_v50 }
 0x66f   : > { %1515 = vpow2.f32 %v1327_v53 }
 0x677   : > { %v1514_v52 = vpop.eup %1513 }
 0x678   : > { %634 = vrot.lane.b32.xlu0 %v1514_v52, %s1573_s11 }
 0x679   : > { %v1516_v54 = vpop.eup %1515 }
 0x67a   : > { %v628_v55 = vadd.f32 1.0, %v1516_v54 }
 0x67c   : > { %1517 = vrcp.f32 %v628_v55 }
 0x686   : > { %v1518_v56 = vpop.eup %1517 }
 0x687   : > { %v632_v59 = vmul.f32 %v1518_v56, %v539_v43 }
 0x6ea   : > { %v635_v57 = vpop.permute.xlu0 %634 }
 0x6eb   : > { %v637_v58 = vmul.f32 %v1518_v56, %v635_v57 }
 0x6ed   : > { %639 = vrot.lane.b32.xlu1 %v637_v58, %s1574_s12  ;;  %v963_v58 = vld [vmem:[#allocation2 + $0x6] sm:$0x1] }
 0x75f   : > { %v640_v60 = vpop.permute.xlu1 %639 }
 0x760   : > { %v642_v61 = vadd.f32 %v640_v60, %v632_v59 }
 0x762   : > { %1519 = vtanh.f32 %v642_v61 }
 0x76c   : > { %v1520_v62 = vpop.eup %1519 }
 0x76d   : > { %645 = vrot.lane.b32.xlu0 %v1520_v62, %s1575_s13 }
 0x7df   : > { %v646_v63 = vpop.permute.xlu0 %645 }
 0x7e0   : > { %v648_v0 = vmul.f32 %v1518_v56, %v646_v63 }
 0x7e2   : > { %650 = vrot.lane.b32.xlu1 %v648_v0, %s1576_s14 }
 0x854   : > { %v651_v2 = vpop.permute.xlu1 %650 }
 0x855   : > { %653 = vst.msk [vmem:[#allocation3 + $0x2] sm:$0x1] %vm446_vm7, %v651_v2  ;;  %1408 = vmatmul.mubr.msk.f32.vlgmr.msra.gmra.mrb[4].mxu0 %vm339_vm8, %v651_v2 }
 0x856   : > { %1468 = vmatpush3.bf16.msk.msra.mxu0 %vm1637_vm4, %v1635_v5  ;;  %1421 = vmatprep.mubr.msk.f32.mxu0 %vm1570_vm1, %v1569_v1 }
 0x857   : > { %1473 = vmatprep.subr.bf16.mxu0 %v1571_v4 }
 0x928   : > { %v723_v7 = vpop.f32.mrb[4].mxu0 }
 0x929   : > { %v727_v8 = vadd.f32 %v723_v7, %v654_v3  ;;  %v1409_v9 = vpop.f32.mrb[5].mxu0 }
 0x92b   : > { %1521 = vtanh.f32 %v727_v8  ;;  %v1330_v11 = vmul.f32 -1.442695, %v727_v8 }
 0x92d   : > { %1523 = vpow2.f32 %v1330_v11 }
 0x935   : > { %v1522_v10 = vpop.eup %1521 }
 0x936   : > { %737 = vrot.lane.b32.xlu0 %v1522_v10, %s1573_s11 }
 0x937   : > { %v1524_v12 = vpop.eup %1523 }
 0x938   : > { %v731_v13 = vadd.f32 1.0, %v1524_v12 }
 0x93a   : > { %1525 = vrcp.f32 %v731_v13 }
 0x944   : > { %v1526_v14 = vpop.eup %1525 }
 0x945   : > { %v735_v17 = vmul.f32 %v1526_v14, %v642_v61 }
 0x9a8   : > { %v738_v15 = vpop.permute.xlu0 %737 }
 0x9a9   : > { %v740_v16 = vmul.f32 %v1526_v14, %v738_v15  ;;  %v1066_v15 = vld [vmem:[#allocation2 + $0x7] sm:$0x1] }
 0x9ab   : > { %742 = vrot.lane.b32.xlu1 %v740_v16, %s1574_s12 }
 0xa1d   : > { %v743_v18 = vpop.permute.xlu1 %742 }
 0xa1e   : > { %v745_v19 = vadd.f32 %v743_v18, %v735_v17 }
 0xa20   : > { %1527 = vtanh.f32 %v745_v19 }
 0xa2a   : > { %v1528_v20 = vpop.eup %1527 }
 0xa2b   : > { %748 = vrot.lane.b32.xlu0 %v1528_v20, %s1575_s13 }
 0xa9d   : > { %v749_v21 = vpop.permute.xlu0 %748 }
 0xa9e   : > { %v751_v22 = vmul.f32 %v1526_v14, %v749_v21 }
 0xaa0   : > { %753 = vrot.lane.b32.xlu1 %v751_v22, %s1576_s14 }
 0xb12   : > { %v754_v23 = vpop.permute.xlu1 %753 }
 0xb13   : > { %756 = vst.msk [vmem:[#allocation3 + $0x3] sm:$0x1] %vm446_vm7, %v754_v23  ;;  %1415 = vmatmul.mubr.msk.f32.vlgmr.msra.gmra.mrb[4].mxu1 %vm339_vm8, %v754_v23 }
 0xb14   : > { %1472 = vmatpush3.bf16.msk.msra.mxu1 %vm1637_vm4, %v1635_v5  ;;  %1428 = vmatprep.mubr.msk.f32.mxu1 %vm1570_vm1, %v1569_v1 }
 0xb15   : > { %1477 = vmatprep.subr.bf16.mxu1 %v1571_v4 }
 0xbe6   : > { %v826_v25 = vpop.f32.mrb[4].mxu1 }
 0xbe7   : > { %v830_v26 = vadd.f32 %v826_v25, %v757_v24  ;;  %v1416_v27 = vpop.f32.mrb[5].mxu1 }
 0xbe9   : > { %1529 = vtanh.f32 %v830_v26  ;;  %v1333_v29 = vmul.f32 -1.442695, %v830_v26 }
 0xbeb   : > { %1531 = vpow2.f32 %v1333_v29 }
 0xbf3   : > { %v1530_v28 = vpop.eup %1529 }
 0xbf4   : > { %840 = vrot.lane.b32.xlu0 %v1530_v28, %s1573_s11 }
 0xbf5   : > { %v1532_v30 = vpop.eup %1531 }
 0xbf6   : > { %v834_v31 = vadd.f32 1.0, %v1532_v30  ;;  %v1170_v30 = vld [vmem:[%s1772_s4] sm:$0xff] }
 0xbf8   : > { %1533 = vrcp.f32 %v834_v31  ;;  %v1171_v31 = vld [vmem:[%s1772_s4 + $0x8] sm:$0x3] }
 0xc02   : > { %v1534_v32 = vpop.eup %1533 }
 0xc03   : > { %v838_v35 = vmul.f32 %v1534_v32, %v745_v19 }
 0xc66   : > { %v841_v33 = vpop.permute.xlu0 %840 }
 0xc67   : > { %v843_v34 = vmul.f32 %v1534_v32, %v841_v33 }
 0xc69   : > { %845 = vrot.lane.b32.xlu1 %v843_v34, %s1574_s12 }
 0xcdb   : > { %v846_v4 = vpop.permute.xlu1 %845 }
 0xcdc   : > { %v848_v36 = vadd.f32 %v846_v4, %v838_v35 }
 0xcde   : > { %1535 = vtanh.f32 %v848_v36 }
 0xce8   : > { %v1536_v37 = vpop.eup %1535 }
 0xce9   : > { %851 = vrot.lane.b32.xlu0 %v1536_v37, %s1575_s13 }
 0xd5b   : > { %v852_v38 = vpop.permute.xlu0 %851 }
 0xd5c   : > { %v854_v39 = vmul.f32 %v1534_v32, %v852_v38  ;;  %v1478_v32 = vpack.c.bf16 %v1171_v31, %v1170_v30 }
 0xd5e   : > { %856 = vrot.lane.b32.xlu1 %v854_v39, %s1576_s14 }
 0xdd0   : > { %v857_v40 = vpop.permute.xlu1 %856 }
 0xdd1   : > { %859 = vst.msk [vmem:[#allocation3 + $0x4] sm:$0x1] %vm446_vm7, %v857_v40  ;;  %1422 = vmatmul.mubr.msk.f32.vlgmr.msra.gmra.mrb[6].mxu0 %vm339_vm8, %v857_v40 }
 0xdd2   : > { %1476 = vmatpush3.bf16.msk.msra.mxu0 %vm1637_vm4, %v1635_v5  ;;  %1435 = vmatprep.mubr.msk.f32.mxu0 %vm1570_vm1, %v1569_v1 }
 0xea4   : > { %v929_v42 = vpop.f32.mrb[6].mxu0 }
 0xea5   : > { %v933_v43 = vadd.f32 %v929_v42, %v860_v41  ;;  %v1423_v44 = vpop.f32.mrb[7].mxu0 }
 0xea7   : > { %1537 = vtanh.f32 %v933_v43  ;;  %v1336_v46 = vmul.f32 -1.442695, %v933_v43 }
 0xea9   : > { %1539 = vpow2.f32 %v1336_v46 }
 0xeb1   : > { %v1538_v45 = vpop.eup %1537 }
 0xeb2   : > { %943 = vrot.lane.b32.xlu0 %v1538_v45, %s1573_s11 }
 0xeb3   : > { %v1540_v47 = vpop.eup %1539 }
 0xeb4   : > { %v937_v48 = vadd.f32 1.0, %v1540_v47 }
 0xeb6   : > { %1541 = vrcp.f32 %v937_v48 }
 0xec0   : > { %v1542_v49 = vpop.eup %1541 }
 0xec1   : > { %v941_v5 = vmul.f32 %v1542_v49, %v848_v36  ;;  %v1343_v36 = vld [vmem:[%s1773_s5] ss:$0 sm:$0xff] }
 0xf24   : > { %v944_v50 = vpop.permute.xlu0 %943 }
 0xf25   : > { %v946_v51 = vmul.f32 %v1542_v49, %v944_v50 }
 0xf27   : > { %948 = vrot.lane.b32.xlu1 %v946_v51, %s1574_s12 }
 0xf99   : > { %v949_v52 = vpop.permute.xlu1 %948 }
 0xf9a   : > { %v951_v53 = vadd.f32 %v949_v52, %v941_v5 }
 0xf9c   : > { %1543 = vtanh.f32 %v951_v53 }
 0xfa6   : > { %v1544_v54 = vpop.eup %1543 }
 0xfa7   : > { %954 = vrot.lane.b32.xlu0 %v1544_v54, %s1575_s13 }
0x1019   : > { %v955_v55 = vpop.permute.xlu0 %954 }
0x101a   : > { %v957_v56 = vmul.f32 %v1542_v49, %v955_v55 }
0x101c   : > { %959 = vrot.lane.b32.xlu1 %v957_v56, %s1576_s14 }
0x108e   : > { %v960_v57 = vpop.permute.xlu1 %959 }
0x108f   : > { %962 = vst.msk [vmem:[#allocation3 + $0x5] sm:$0x1] %vm446_vm7, %v960_v57  ;;  %1429 = vmatmul.mubr.msk.f32.vlgmr.msra.gmra.mrb[6].mxu1 %vm339_vm8, %v960_v57 }
0x1090   : > { %1442 = vmatprep.mubr.msk.f32.mxu1 %vm1570_vm1, %v1569_v1  ;;  %1480 = vmatpush3.bf16.msk.msra.mxu1 %vm1637_vm4, %v1478_v32 }
0x1162   : > { %v1032_v59 = vpop.f32.mrb[6].mxu1 }
0x1163   : > { %v1036_v60 = vadd.f32 %v1032_v59, %v963_v58  ;;  %v1430_v61 = vpop.f32.mrb[7].mxu1 }
0x1165   : > { %1545 = vtanh.f32 %v1036_v60  ;;  %v1339_v63 = vmul.f32 -1.442695, %v1036_v60 }
0x1167   : > { %1547 = vpow2.f32 %v1339_v63 }
0x116f   : > { %v1546_v62 = vpop.eup %1545 }
0x1170   : > { %1046 = vrot.lane.b32.xlu0 %v1546_v62, %s1573_s11 }
0x1171   : > { %v1548_v0 = vpop.eup %1547 }
0x1172   : > { %v1040_v2 = vadd.f32 1.0, %v1548_v0 }
0x1174   : > { %1549 = vrcp.f32 %v1040_v2 }
0x117e   : > { %v1550_v3 = vpop.eup %1549 }
0x117f   : > { %v1044_v9 = vmul.f32 %v1550_v3, %v951_v53 }
0x11e2   : > { %v1047_v7 = vpop.permute.xlu0 %1046 }
0x11e3   : > { %v1049_v8 = vmul.f32 %v1550_v3, %v1047_v7 }
0x11e5   : > { %1051 = vrot.lane.b32.xlu1 %v1049_v8, %s1574_s12 }
0x1257   : > { %v1052_v1 = vpop.permute.xlu1 %1051 }
0x1258   : > { %v1054_v10 = vadd.f32 %v1052_v1, %v1044_v9 }
0x125a   : > { %1551 = vtanh.f32 %v1054_v10 }
0x1264   : > { %v1552_v11 = vpop.eup %1551 }
0x1265   : > { %1057 = vrot.lane.b32.xlu0 %v1552_v11, %s1575_s13 }
0x12d7   : > { %v1058_v12 = vpop.permute.xlu0 %1057 }
0x12d8   : > { %v1060_v13 = vmul.f32 %v1550_v3, %v1058_v12 }
0x12da   : > { %1062 = vrot.lane.b32.xlu1 %v1060_v13, %s1576_s14 }
0x134c   : > { %v1063_v14 = vpop.permute.xlu1 %1062 }
0x134d   : > { %1065 = vst.msk [vmem:[#allocation3 + $0x6] sm:$0x1] %vm446_vm7, %v1063_v14  ;;  %1436 = vmatmul.mubr.msk.f32.vlgmr.msra.gmra.mrb[8].mxu0 %vm339_vm8, %v1063_v14 }
0x1420   : > { %v1135_v16 = vpop.f32.mrb[8].mxu0 }
0x1421   : > { %v1139_v17 = vadd.f32 %v1135_v16, %v1066_v15  ;;  %v1437_v18 = vpop.f32.mrb[9].mxu0 }
0x1423   : > { %1553 = vtanh.f32 %v1139_v17  ;;  %v1342_v20 = vmul.f32 -1.442695, %v1139_v17 }
0x1425   : > { %1555 = vpow2.f32 %v1342_v20 }
0x142d   : > { %v1554_v19 = vpop.eup %1553 }
0x142e   : > { %1149 = vrot.lane.b32.xlu0 %v1554_v19, %s1573_s11 }
0x142f   : > { %v1556_v21 = vpop.eup %1555 }
0x1430   : > { %v1143_v22 = vadd.f32 1.0, %v1556_v21 }
0x1432   : > { %1557 = vrcp.f32 %v1143_v22 }
0x143c   : > { %v1558_v23 = vpop.eup %1557 }
0x143d   : > { %v1147_v26 = vmul.f32 %v1558_v23, %v1054_v10 }
0x14a0   : > { %v1150_v24 = vpop.permute.xlu0 %1149 }
0x14a1   : > { %v1152_v25 = vmul.f32 %v1558_v23, %v1150_v24 }
0x14a3   : > { %1154 = vrot.lane.b32.xlu1 %v1152_v25, %s1574_s12 }
0x1515   : > { %v1155_v27 = vpop.permute.xlu1 %1154 }
0x1516   : > { %v1157_v28 = vadd.f32 %v1155_v27, %v1147_v26 }
0x1518   : > { %1559 = vtanh.f32 %v1157_v28 }
0x1522   : > { %v1560_v29 = vpop.eup %1559 }
0x1523   : > { %1160 = vrot.lane.b32.xlu0 %v1560_v29, %s1575_s13 }
0x1595   : > { %v1161_v33 = vpop.permute.xlu0 %1160 }
0x1596   : > { %v1163_v34 = vmul.f32 %v1558_v23, %v1161_v33 }
0x1598   : > { %1165 = vrot.lane.b32.xlu1 %v1163_v34, %s1576_s14 }
0x160a   : > { %v1166_v35 = vpop.permute.xlu1 %1165 }
0x160b   : > { %1168 = vst.msk [vmem:[#allocation3 + $0x7] sm:$0x1] %vm446_vm7, %v1166_v35 }
0x1612   : > { %v1169_v4 = vld [vmem:[#allocation3] sm:$0xff] }
0x1613   : > { %1443 = vmatmul.mubr.msk.f32.vlgmr.msra.gmra.mrb[8].mxu1 %vm339_vm8, %v1169_v4 }
0x16e6   : > { %v1251_v6 = vpop.f32.mrb[8].mxu1 }
0x16e7   : > { %v1252_v37 = vadd.f32 %v1343_v36, %v1251_v6  ;;  %v1444_v38 = vpop.f32.mrb[9].mxu1 }
0x16e9   : > { %1256 = vst.msk [vmem:[%s246_s25] sm:$0xff] %vm1255_vm9, %v1252_v37 }
0x16ea PF: > { %s16_s21 = sadd.s32 1, %s1567_s21  }
0x16eb   : > { %p13_p4 = scmp.ge.s32.totalorder %s16_s21, 4  }
0x16ed   :  { %15 = sbr.rel (!%p13_p4) target bundleno = 1 (0x1), region = 74 }

</bundles_post_ra>
